<compile_context>
chip_gen: v7x
topology: tpu7x:2x2x1
jax: 0.10.0
libtpu: 0.0.40
codegen_flags: <defaults>
</compile_context>

<pallas_src>
import jax
import jax.numpy as jnp
from jax.experimental import pallas as pl
from jax.experimental.pallas import tpu as pltpu


def _silu_kernel(x_ref, o_ref):
    # Upcast to f32 so sub-32-bit inputs (bf16/fp8) get full-precision math;
    # the cast is free under the HBM roofline.  sigmoid = 0.5*tanh(x/2)+0.5
    # keeps the transcendental on the (otherwise idle) EUP slot.
    x = x_ref[...].astype(jnp.float32)
    sig = 0.5 * jnp.tanh(0.5 * x) + 0.5
    o_ref[...] = (x * sig).astype(o_ref.dtype)


def _chip_defaults():
    """(target_block_bytes, vmem_limit_bytes_or_None, tensorcores_per_chip)."""
    kind = ""
    try:
        kind = jax.devices()[0].device_kind.lower()
    except Exception:
        pass
    if "v7" in kind:
        # ~3.2 TB/s HBM: bigger blocks amortize the ~0.35us/step cost.
        # in+out double-buffered at 8 MiB ~= 32 MiB, so raise the scoped limit.
        return 8 * 1024 * 1024, 40 * 1024 * 1024, 2
    if "v5 lite" in kind or "v5lite" in kind or "v5e" in kind:
        # 16 MiB scoped-VMEM default: keep 2 MiB blocks (~8 MiB resident).
        return 2 * 1024 * 1024, None, 1
    # v6e / unknown: ~1.3-1.4 TB/s HBM, 32 MiB scoped default.
    return 3 * 1024 * 1024, None, 1


def _choose_slab(total):
    """Widest lane-dense (rows, lane) view of `total` elems, lane % 128 == 0."""
    for lane in (8192, 4096, 2048, 1024, 512, 256, 128):
        if total % lane == 0:
            return total // lane, lane
    return None


def _pick_tile_rows(rows, lane, itemsize, target_block_bytes, row_mult, num_tc):
    """Tile row count: a multiple of row_mult (or full rows), ~target bytes."""
    if rows <= row_mult:
        return rows                               # single full-dim block
    cap = max(row_mult,
              (target_block_bytes // (lane * itemsize)) // row_mult * row_mult)
    t = min(cap, (rows // row_mult) * row_mult)
    # With >1 TensorCore per chip, avoid a 1-step grid so the "parallel"
    # axis can actually shard across cores.
    if num_tc > 1 and t >= rows and rows >= 2 * row_mult:
        half = (rows + 1) // 2
        t = max(row_mult, (half + row_mult - 1) // row_mult * row_mult)
    return max(t, row_mult)


def lambda_forward(x, *, donate_input=False):
    """Pallas implementation of Lambda(fn = lambda x: x * sigmoid(x))."""
    orig_shape = x.shape
    total = x.size
    itemsize = jnp.dtype(x.dtype).itemsize
    row_mult = max(8, 32 // itemsize)             # 8 f32, 16 bf16, 32 int8/fp8
    target_block_bytes, vmem_limit, num_tc = _chip_defaults()

    slab = _choose_slab(total)
    if slab is None:
        # Element count not a multiple of 128.
        if total * itemsize <= 2 * 1024 * 1024:
            slab = (1, total)                     # whole-array single block
        else:
            # TODO(synk): large tensors whose element count is not a multiple
            # of 128 -- kernel covers the divisible prefix, the <128-element
            # tail runs in plain jnp; the final concatenate costs one extra
            # output copy.
            head = (total // 128) * 128
            flat = x.reshape(-1)
            head_out = lambda_forward(flat[:head], donate_input=donate_input)
            tail = flat[head:].astype(jnp.float32)
            tail_out = (tail * (0.5 * jnp.tanh(0.5 * tail) + 0.5)).astype(x.dtype)
            return jnp.concatenate([head_out, tail_out]).reshape(orig_shape)

    rows, lane = slab
    x2d = x.reshape(rows, lane)                   # pure reshape, no data copy
    tile_rows = _pick_tile_rows(rows, lane, itemsize, target_block_bytes,
                                row_mult, num_tc)
    grid = (pl.cdiv(rows, tile_rows),)            # ragged last block is masked

    out2d = pl.pallas_call(
        _silu_kernel,
        out_shape=jax.ShapeDtypeStruct((rows, lane), x.dtype),
        grid=grid,
        in_specs=[pl.BlockSpec((tile_rows, lane), lambda i: (i, 0))],
        out_specs=pl.BlockSpec((tile_rows, lane), lambda i: (i, 0)),
        input_output_aliases={0: 0} if donate_input else {},
        cost_estimate=pl.CostEstimate(
            flops=5 * total,
            transcendentals=total,
            bytes_accessed=2 * total * itemsize),
        compiler_params=pltpu.CompilerParams(
            dimension_semantics=("parallel",),
            vmem_limit_bytes=vmem_limit),
    )(x2d)

    return out2d.reshape(orig_shape)


if __name__ == "__main__":
    key = jax.random.PRNGKey(0)
    # Small NCHW input consistent with typical Lambda usage inside a conv net.
    x = jax.random.normal(key, (2, 4, 16, 16), dtype=jnp.float32)

    out = lambda_forward(x)
    jax.block_until_ready(out)

    # Correctness check against a plain-JAX reference of the same fn.
    ref = x * jax.nn.sigmoid(x)
    assert out.shape == x.shape and out.dtype == x.dtype
    assert jnp.allclose(out, ref, atol=1e-5, rtol=1e-5)
    print("KERNEL_OK")
</pallas_src>

<mosaic_0001>
module attributes {stable_mosaic.version = 11 : i64} {
  func.func @_silu_kernel(%arg0: i32, %arg1: memref<1x2048xf32, #tpu.memory_space<vmem>>, %arg2: memref<1x2048xf32, #tpu.memory_space<vmem>>) attributes {dimension_semantics = [#tpu.dimension_semantics<parallel>], iteration_bounds = array<i64: 1>, scalar_prefetch = 0 : i64, scratch_operands = 0 : i64, tpu.core_type = #tpu.core_type<tc>, window_params = [{transform_indices = @transform_0, window_bounds = array<i64: 1, 2048>}, {transform_indices = @transform_1, window_bounds = array<i64: 1, 2048>}]} {
    %c0 = arith.constant 0 : index
    %c0_0 = arith.constant 0 : index
    %0 = vector.load %arg1[%c0, %c0_0] : memref<1x2048xf32, #tpu.memory_space<vmem>>, vector<1x2048xf32>
    %cst = arith.constant 5.000000e-01 : f32
    %1 = vector.broadcast %cst : f32 to vector<1x2048xf32>
    %2 = arith.mulf %1, %0 : vector<1x2048xf32>
    %3 = math.tanh %2 : vector<1x2048xf32>
    %cst_1 = arith.constant 5.000000e-01 : f32
    %4 = vector.broadcast %cst_1 : f32 to vector<1x2048xf32>
    %5 = arith.mulf %4, %3 : vector<1x2048xf32>
    %cst_2 = arith.constant 5.000000e-01 : f32
    %6 = vector.broadcast %cst_2 : f32 to vector<1x2048xf32>
    %7 = arith.addf %5, %6 : vector<1x2048xf32>
    %8 = arith.mulf %0, %7 : vector<1x2048xf32>
    %c0_3 = arith.constant 0 : index
    %c0_4 = arith.constant 0 : index
    %9 = vector.load %arg2[%c0_3, %c0_4] : memref<1x2048xf32, #tpu.memory_space<vmem>>, vector<1x2048xf32>
    tpu.vector_store %arg2[%c0_3, %c0_4], %8 {strides = array<i32>} : memref<1x2048xf32, #tpu.memory_space<vmem>>, vector<1x2048xf32>,
    return
  }
  func.func @transform_0(%arg0: i32) -> (i32, i32) {
    %c0_i32 = arith.constant 0 : i32
    %c0_i32_0 = arith.constant 0 : i32
    return %arg0, %c0_i32 : i32, i32
  }
  func.func @transform_1(%arg0: i32) -> (i32, i32) {
    %c0_i32 = arith.constant 0 : i32
    %c0_i32_0 = arith.constant 0 : i32
    return %arg0, %c0_i32 : i32, i32
  }
}

</mosaic_0001>

<bundles_post_ra>
// kernel: tpu_custom_call.1
= control target key start
LH: loop header
LB: loop body
LE: loop exit
PB: predicated region body
PF: predicated region fallthrough
CT: control target
= control target key end

     0   :  { %6 = vsyncpa [#allocation3], 0  ;;  %s140_s0 = inlined_call_operand.hbm [shape: f32[1,2048], index: 0, kind: input, shape index: {}]   ;;  %s141_s1 = inlined_call_operand.hbm [shape: f32[1,2048], index: 1, kind: output, shape index: {}]  }
   0x1   :  { %7 = vsyncpa [#allocation4], 0  ;;  %s104_s6 = smov [#allocation2]   ;;  %s56_s10 = scalar_lea.hbm %s140_s0, 256 }
   0x2   :  { %s14_s7 = sshll.u32 %s104_s6, 4  ;;  %p57_p0 = scmp.ne.s32.totalorder %s140_s0, %s56_s10  ;;  %s15_s7 = int_to_ptr.vmem [resolvable:$true] %s14_s7 }
   0x3   :  { %p60_p1 = scmp.lt.u32.totalorder %s56_s10, %s140_s0 }
   0x5   :  { %p62_p2 = pnand %p60_p1, %p57_p0 }
   0x7   :  { %65 = shalt.err (!%p62_p2)
}
   0x8   :  { %s66_s15 = scalar_lea.vmem %s15_s7, 256  ;;  %p71_p4 = scmp.lt.s32.totalorder %s15_s7, %s15_s7 }
   0x9   :  { %p67_p3 = scmp.ne.s32.totalorder %s15_s7, %s66_s15  ;;  %p72_p5 = scmp.lt.s32.totalorder %s66_s15, %s66_s15 }
   0xb   :  { %p73_p6 = por %p72_p5, %p71_p4 }
   0xd   :  { %p74_p7 = pnand %p73_p6, %p67_p3 }
   0xf   :  { %77 = shalt.err (!%p74_p7)
}
  0x10   :  { %17 = dma.hbm_to_vmem [thread:$0]  %s140_s0, 256, %s15_s7, [#allocation3]  }
  0x11   :  { %100 = dma.done.wait [#allocation3], 256  }
  0x12   :  { %101 = vsyncadd [#allocation3], 4294967040  ;;  %v21_v0 = vld [vmem:[#allocation2] sm:$0xff]  ;;  %v22_v1 = vld [vmem:[#allocation2 + $0x8] sm:$0xff]  ;;  %s105_s18 = smov [#allocation5]  }
  0x13   :  { %v23_v2 = vmul.f32 0.5, %v21_v0  ;;  %v24_v3 = vmul.f32 0.5, %v22_v1  ;;  %s41_s19 = sshll.u32 %s105_s18, 4  ;;  %s42_s19 = int_to_ptr.vmem [resolvable:$true] %s41_s19 }
  0x14   :  { %s78_s0 = scalar_lea.vmem %s42_s19, 256  ;;  %p83_p9 = scmp.lt.s32.totalorder %s42_s19, %s42_s19 }
  0x15   :  { %52 = vtanh.f32 %v23_v2  ;;  %p79_p8 = scmp.ne.s32.totalorder %s42_s19, %s78_s0  ;;  %p84_p10 = scmp.lt.s32.totalorder %s78_s0, %s78_s0 }
  0x16   :  { %54 = vtanh.f32 %v24_v3 }
  0x17   :  { %p85_p11 = por %p84_p10, %p83_p9 }
  0x19   :  { %p86_p12 = pnand %p85_p11, %p79_p8 }
  0x1f   :  { %v53_v4 = vpop.eup %52 }
  0x20   :  { %v55_v5 = vpop.eup %54  ;;  %v27_v6 = vmul.f32 0.5, %v53_v4 }
  0x21   :  { %v28_v7 = vmul.f32 0.5, %v55_v5 }
  0x22   :  { %v29_v8 = vadd.f32 0.5, %v27_v6 }
  0x23   :  { %v30_v9 = vadd.f32 0.5, %v28_v7 }
  0x24   :  { %v31_v10 = vmul.f32 %v29_v8, %v21_v0 }
  0x25   :  { %v32_v11 = vmul.f32 %v30_v9, %v22_v1 }
  0x26   :  { %33 = vst [vmem:[#allocation5] sm:$0xff] %v31_v10 }
  0x27   :  { %34 = vst [vmem:[#allocation5 + $0x8] sm:$0xff] %v32_v11 }
  0x28   :  { %89 = shalt.err (!%p86_p12)
}
  0x29   :  { %s90_s22 = scalar_lea.hbm %s141_s1, 256 }
  0x2a   :  { %p91_p13 = scmp.ne.s32.totalorder %s141_s1, %s90_s22  ;;  %p94_p0 = scmp.lt.u32.totalorder %s90_s22, %s141_s1 }
  0x2c   :  { %p96_p1 = pnand %p94_p0, %p91_p13 }
  0x2e   :  { %99 = shalt.err (!%p96_p1)
}
  0x2f   :  { %44 = dma.vmem_to_hbm [thread:$0]  %s42_s19, 256, %s141_s1, [#allocation4]  }
  0x30   :  { %102 = dma.done.wait [#allocation4], 256  }
  0x31   :  { %103 = vsyncadd [#allocation4], 4294967040 }
  0x32   :  { %48 = vsyncpa [#allocation3], 1 }
  0x33   :  { %49 = vsyncpa [#allocation4], 1 }

</bundles_post_ra>
